<compile_context>
chip_gen: v6e
topology: v6e:2x2x1
jax: 0.10.0
libtpu: 0.0.40
codegen_flags: <defaults>
</compile_context>

<pallas_src>
import jax
import jax.numpy as jnp
from jax.experimental import pallas as pl
from jax.experimental.pallas import tpu as pltpu

STATE_SIZE = 4            # CartPole observation dim
ACTION_SIZE = 2           # CartPole action dim
HIDDEN = 24

STATE_PAD = 8             # x^T rows: 4 features + 1 ones-row (bias) + 3 zeros
HPAD = 32                 # hidden rows padded: 24 hidden + 1 ones-row + 7 zeros
HEAD_PAD = 8              # head rows padded: 1 value + ACTION_SIZE adv + zeros
LANES = 128

# ---- parameter-slab layout (rows x 128 lanes, f32) -------------------------
# Each block is a transposed, bias-augmented weight matrix:
#   rows [ 0,32) cols [0, 8):  W1^T  (+ b1 in col 4, ones-passthrough at [24,4])
#   rows [32,64) cols [0,32):  W2^T  (+ b2 in col 24, ones-passthrough at [56,24])
#   rows [64,72) cols [0,32):  [wv^T | wa^T] head (+ [bv | ba] in col 24)
W1_ROW = 0
W2_ROW = 32
WH_ROW = 64
SLAB_ROWS = 72


def dueling_dqn_kernel(x_ref, slab_ref, o_ref):
    xt = x_ref[...]                                              # (8, tb)

    # fc1 + relu  (bias folded via the ones-row of xt)
    w1 = slab_ref[W1_ROW:W1_ROW + HPAD, 0:STATE_PAD]             # (32, 8)
    h1 = jnp.maximum(
        jnp.dot(w1, xt, preferred_element_type=jnp.float32), 0.0)   # (32, tb)

    # fc2 + relu  (bias folded via the ones-row of h1, row 24)
    w2 = slab_ref[W2_ROW:W2_ROW + HPAD, 0:HPAD]                  # (32, 32)
    h2 = jnp.maximum(
        jnp.dot(w2, h1, preferred_element_type=jnp.float32), 0.0)   # (32, tb)

    # fused value|advantage head: one matmul, biases folded the same way
    wh = slab_ref[WH_ROW:WH_ROW + HEAD_PAD, 0:HPAD]              # (8, 32)
    y = jnp.dot(wh, h2, preferred_element_type=jnp.float32)      # (8, tb)

    value = y[0:1, :]                                            # (1, tb)
    adv = y[1:1 + ACTION_SIZE, :]                                # (A, tb)

    # mean over actions as unrolled sublane slice-adds (A is tiny & static)
    adv_sum = y[1:2, :]
    for a in range(1, ACTION_SIZE):
        adv_sum = adv_sum + y[1 + a:2 + a, :]
    adv_mean = adv_sum * (1.0 / ACTION_SIZE)                     # (1, tb)

    # lane-dense store: batch on the 128-lane axis
    o_ref[...] = adv + (value - adv_mean)                        # (A, tb)


def dueling_dqn_forward(x, slab, *, block_b=1024, lane_mult=256):
    """x: (B, STATE_SIZE) f32; slab: (SLAB_ROWS, LANES) packed params.

    Returns (B, ACTION_SIZE) Q-values, matching the PyTorch module.
    """
    B = x.shape[0]

    # Batch tile: multiple of lane_mult (256 -> fills v6e/v7x MXU N dim, and
    # is a multiple of 128 for v5e), capped at block_b.  Typical batches are
    # a single grid step.
    if B > block_b:
        tb = block_b
    else:
        tb = max(lane_mult, -(-B // lane_mult) * lane_mult)
    Bp = -(-B // tb) * tb
    grid_steps = Bp // tb

    # Wrapper-side layout plumbing: batch-on-lanes transposed input with the
    # feature dim padded to 8 sublanes and a constant ones-row for bias fold.
    xt = jnp.zeros((STATE_PAD, Bp), jnp.float32)
    xt = xt.at[:STATE_SIZE, :B].set(x.T)
    xt = xt.at[STATE_SIZE, :].set(1.0)

    out = pl.pallas_call(
        dueling_dqn_kernel,
        out_shape=jax.ShapeDtypeStruct((ACTION_SIZE, Bp), jnp.float32),
        grid=(grid_steps,),
        in_specs=[
            pl.BlockSpec((STATE_PAD, tb), lambda i: (0, i)),
            # constant index_map: the 36 KiB slab stays resident in VMEM
            pl.BlockSpec((SLAB_ROWS, LANES), lambda i: (0, 0)),
        ],
        out_specs=pl.BlockSpec((ACTION_SIZE, tb), lambda i: (0, i)),
        compiler_params=pltpu.CompilerParams(
            dimension_semantics=(
                ("parallel",) if grid_steps > 1 else ("arbitrary",))),
    )(xt, slab)
    return out[:, :B].T


def init_params(key):
    """Deterministic init mimicking PyTorch Linear default (uniform +/-1/sqrt(fan_in))."""
    def linear(k, fan_in, fan_out):
        kw, kb = jax.random.split(k)
        bound = 1.0 / jnp.sqrt(fan_in)
        w = jax.random.uniform(kw, (fan_in, fan_out), jnp.float32, -bound, bound)
        b = jax.random.uniform(kb, (1, fan_out), jnp.float32, -bound, bound)
        return w, b

    k1, k2, k3, k4 = jax.random.split(key, 4)
    w1, b1 = linear(k1, STATE_SIZE, HIDDEN)
    w2, b2 = linear(k2, HIDDEN, HIDDEN)
    wv, bv = linear(k3, HIDDEN, 1)
    wa, ba = linear(k4, HIDDEN, ACTION_SIZE)
    return dict(w1=w1, b1=b1, w2=w2, b2=b2, wv=wv, bv=bv, wa=wa, ba=ba)


def pack_params(p):
    """Pack transposed, bias-augmented weights into one (SLAB_ROWS, LANES) slab."""
    slab = jnp.zeros((SLAB_ROWS, LANES), jnp.float32)

    # layer 1 block: W1^T with bias column at STATE_SIZE, ones-passthrough row
    slab = slab.at[W1_ROW:W1_ROW + HIDDEN, 0:STATE_SIZE].set(p["w1"].T)
    slab = slab.at[W1_ROW:W1_ROW + HIDDEN, STATE_SIZE].set(p["b1"].reshape(-1))
    slab = slab.at[W1_ROW + HIDDEN, STATE_SIZE].set(1.0)

    # layer 2 block: W2^T with bias column at HIDDEN, ones-passthrough row
    slab = slab.at[W2_ROW:W2_ROW + HIDDEN, 0:HIDDEN].set(p["w2"].T)
    slab = slab.at[W2_ROW:W2_ROW + HIDDEN, HIDDEN].set(p["b2"].reshape(-1))
    slab = slab.at[W2_ROW + HIDDEN, HIDDEN].set(1.0)

    # fused head block: row 0 = value stream, rows 1..A = advantage stream
    slab = slab.at[WH_ROW, 0:HIDDEN].set(p["wv"].reshape(-1))
    slab = slab.at[WH_ROW, HIDDEN].set(p["bv"].reshape(-1)[0])
    slab = slab.at[WH_ROW + 1:WH_ROW + 1 + ACTION_SIZE, 0:HIDDEN].set(p["wa"].T)
    slab = slab.at[WH_ROW + 1:WH_ROW + 1 + ACTION_SIZE, HIDDEN].set(
        p["ba"].reshape(-1))
    return slab


def reference_forward(x, p):
    h1 = jnp.maximum(x @ p["w1"] + p["b1"], 0.0)
    h2 = jnp.maximum(h1 @ p["w2"] + p["b2"], 0.0)
    value = h2 @ p["wv"] + p["bv"]
    adv = h2 @ p["wa"] + p["ba"]
    return value + (adv - adv.mean(axis=1, keepdims=True))


if __name__ == "__main__":
    key = jax.random.PRNGKey(0)
    kx, kp, kx2 = jax.random.split(key, 3)
    params = init_params(kp)
    slab = pack_params(params)

    # small "act"-style batch (single grid step)
    x_small = jax.random.normal(kx, (8, STATE_SIZE), jnp.float32)
    out_small = jax.block_until_ready(dueling_dqn_forward(x_small, slab))
    ref_small = reference_forward(x_small, params)
    assert out_small.shape == (8, ACTION_SIZE)
    assert jnp.allclose(out_small, ref_small, atol=1e-4, rtol=1e-4), \
        "small-batch mismatch vs JAX reference"

    # ragged replay-style batch, single-step grid with padding
    x_big = jax.random.normal(kx2, (300, STATE_SIZE), jnp.float32)
    out_big = jax.block_until_ready(dueling_dqn_forward(x_big, slab))
    ref_big = reference_forward(x_big, params)
    assert out_big.shape == (300, ACTION_SIZE)
    assert jnp.allclose(out_big, ref_big, atol=1e-4, rtol=1e-4), \
        "large-batch mismatch vs JAX reference"

    # force a multi-step grid to exercise the batch tiling path
    out_tiled = jax.block_until_ready(
        dueling_dqn_forward(x_big, slab, block_b=256))
    assert out_tiled.shape == (300, ACTION_SIZE)
    assert jnp.allclose(out_tiled, ref_big, atol=1e-4, rtol=1e-4), \
        "multi-tile mismatch vs JAX reference"

    print("KERNEL_OK")
</pallas_src>

<mosaic_0001>
module attributes {stable_mosaic.version = 11 : i64} {
  func.func @dueling_dqn_kernel(%arg0: i32, %arg1: memref<8x256xf32, #tpu.memory_space<vmem>>, %arg2: memref<72x128xf32, #tpu.memory_space<vmem>>, %arg3: memref<2x256xf32, #tpu.memory_space<vmem>>) attributes {dimension_semantics = [#tpu.dimension_semantics<arbitrary>], iteration_bounds = array<i64: 1>, scalar_prefetch = 0 : i64, scratch_operands = 0 : i64, tpu.core_type = #tpu.core_type<tc>, window_params = [{transform_indices = @transform_0, window_bounds = array<i64: 8, 256>}, {pipeline_mode = #tpu.pipeline_mode<synchronous>, transform_indices = @transform_1, window_bounds = array<i64: 72, 128>}, {transform_indices = @transform_2, window_bounds = array<i64: 2, 256>}]} {
    %c0 = arith.constant 0 : index
    %c0_0 = arith.constant 0 : index
    %0 = vector.load %arg1[%c0, %c0_0] : memref<8x256xf32, #tpu.memory_space<vmem>>, vector<8x256xf32>
    %c0_1 = arith.constant 0 : index
    %c0_2 = arith.constant 0 : index
    %1 = vector.load %arg2[%c0_1, %c0_2] : memref<72x128xf32, #tpu.memory_space<vmem>>, vector<32x8xf32>
    %cst = arith.constant dense<0.000000e+00> : vector<32x256xf32>
    %2 = tpu.matmul %1, %0, %cst {dimension_numbers = #tpu.dot_dimension_numbers<[1], [0], [0], [1], [0, 0, 1, 1], [], []>} : vector<32x8xf32>, vector<8x256xf32>, vector<32x256xf32> -> vector<32x256xf32>
    %cst_3 = arith.constant 0.000000e+00 : f32
    %3 = vector.broadcast %cst_3 : f32 to vector<32x256xf32>
    %4 = arith.maximumf %2, %3 : vector<32x256xf32>
    %c32 = arith.constant 32 : index
    %c0_4 = arith.constant 0 : index
    %5 = vector.load %arg2[%c32, %c0_4] : memref<72x128xf32, #tpu.memory_space<vmem>>, vector<32x32xf32>
    %cst_5 = arith.constant dense<0.000000e+00> : vector<32x256xf32>
    %6 = tpu.matmul %5, %4, %cst_5 {dimension_numbers = #tpu.dot_dimension_numbers<[1], [0], [0], [1], [0, 0, 1, 1], [], []>} : vector<32x32xf32>, vector<32x256xf32>, vector<32x256xf32> -> vector<32x256xf32>
    %cst_6 = arith.constant 0.000000e+00 : f32
    %7 = vector.broadcast %cst_6 : f32 to vector<32x256xf32>
    %8 = arith.maximumf %6, %7 : vector<32x256xf32>
    %c64 = arith.constant 64 : index
    %c0_7 = arith.constant 0 : index
    %9 = vector.load %arg2[%c64, %c0_7] : memref<72x128xf32, #tpu.memory_space<vmem>>, vector<8x32xf32>
    %cst_8 = arith.constant dense<0.000000e+00> : vector<8x256xf32>
    %10 = tpu.matmul %9, %8, %cst_8 {dimension_numbers = #tpu.dot_dimension_numbers<[1], [0], [0], [1], [0, 0, 1, 1], [], []>} : vector<8x32xf32>, vector<32x256xf32>, vector<8x256xf32> -> vector<8x256xf32>
    %11 = vector.extract_strided_slice %10 {offsets = [0, 0], sizes = [1, 256], strides = [1, 1]} : vector<8x256xf32> to vector<1x256xf32>
    %12 = vector.extract_strided_slice %10 {offsets = [1, 0], sizes = [2, 256], strides = [1, 1]} : vector<8x256xf32> to vector<2x256xf32>
    %13 = vector.extract_strided_slice %10 {offsets = [1, 0], sizes = [1, 256], strides = [1, 1]} : vector<8x256xf32> to vector<1x256xf32>
    %14 = vector.extract_strided_slice %10 {offsets = [2, 0], sizes = [1, 256], strides = [1, 1]} : vector<8x256xf32> to vector<1x256xf32>
    %15 = arith.addf %13, %14 : vector<1x256xf32>
    %cst_9 = arith.constant 5.000000e-01 : f32
    %16 = vector.broadcast %cst_9 : f32 to vector<1x256xf32>
    %17 = arith.mulf %15, %16 : vector<1x256xf32>
    %18 = arith.subf %11, %17 : vector<1x256xf32>
    %19 = vector.broadcast %18 : vector<1x256xf32> to vector<2x256xf32>
    %20 = arith.addf %12, %19 : vector<2x256xf32>
    %c0_10 = arith.constant 0 : index
    %c0_11 = arith.constant 0 : index
    %21 = vector.load %arg3[%c0_10, %c0_11] : memref<2x256xf32, #tpu.memory_space<vmem>>, vector<2x256xf32>
    tpu.vector_store %arg3[%c0_10, %c0_11], %20 {strides = array<i32>} : memref<2x256xf32, #tpu.memory_space<vmem>>, vector<2x256xf32>,
    return
  }
  func.func @transform_0(%arg0: i32) -> (i32, i32) {
    %c0_i32 = arith.constant 0 : i32
    %c0_i32_0 = arith.constant 0 : i32
    return %c0_i32, %arg0 : i32, i32
  }
  func.func @transform_1(%arg0: i32) -> (i32, i32) {
    %c0_i32 = arith.constant 0 : i32
    %c0_i32_0 = arith.constant 0 : i32
    %c0_i32_1 = arith.constant 0 : i32
    return %c0_i32, %c0_i32_0 : i32, i32
  }
  func.func @transform_2(%arg0: i32) -> (i32, i32) {
    %c0_i32 = arith.constant 0 : i32
    %c0_i32_0 = arith.constant 0 : i32
    return %c0_i32, %arg0 : i32, i32
  }
}

</mosaic_0001>

<bundles_post_ra>
// kernel: tpu_custom_call.1
= control target key start
LH: loop header
LB: loop body
LE: loop exit
PB: predicated region body
PF: predicated region fallthrough
CT: control target
= control target key end

     0   :  { %7 = vsyncpa [#allocation3], 0  ;;  %s530_s0 = inlined_call_operand.hbm [shape: f32[8,256], index: 0, kind: input, shape index: {}]   ;;  %s531_s1 = inlined_call_operand.hbm [shape: f32[72,128], index: 1, kind: input, shape index: {}]   ;;  %s532_s2 = inlined_call_operand.hbm [shape: f32[2,256], index: 2, kind: output, shape index: {}]  }
   0x1   :  { %8 = vsyncpa [#allocation6], 0 }
   0x2   :  { %9 = vsyncpa [#allocation4], 0  ;;  %s494_s9 = smov [#allocation2]   ;;  %s495_s11 = smov [#allocation5]  }
   0x3   :  { %s16_s10 = sshll.u32 %s494_s9, 4  ;;  %s25_s12 = sshll.u32 %s495_s11, 4  ;;  %s17_s10 = int_to_ptr.vmem [resolvable:$true] %s16_s10  ;;  %s26_s12 = int_to_ptr.vmem [resolvable:$true] %s25_s12 }
   0x4   :  { %s436_s13 = scalar_lea.vmem %s17_s10, 256  ;;  %p441_p1 = scmp.lt.s32.totalorder %s17_s10, %s17_s10 }
   0x5   :  { %p437_p0 = scmp.ne.s32.totalorder %s17_s10, %s436_s13  ;;  %p442_p2 = scmp.lt.s32.totalorder %s436_s13, %s436_s13 }
   0x7   :  { %p443_p3 = por %p442_p2, %p441_p1 }
   0x9   :  { %p444_p4 = pnand %p443_p3, %p437_p0 }
   0xb   :  { %447 = shalt.err (!%p444_p4)
}
   0xc   :  { %19 = dma.hbm_to_vmem [thread:$0]  %s530_s0, 256, %s17_s10, [#allocation3]  }
   0xd   :  { %s456_s16 = scalar_lea.vmem %s26_s12, 1152  ;;  %p461_p6 = scmp.lt.s32.totalorder %s26_s12, %s26_s12 }
   0xe   :  { %p457_p5 = scmp.ne.s32.totalorder %s26_s12, %s456_s16  ;;  %p462_p7 = scmp.lt.s32.totalorder %s456_s16, %s456_s16 }
  0x10   :  { %p463_p8 = por %p462_p7, %p461_p6 }
  0x12   :  { %p464_p9 = pnand %p463_p8, %p457_p5 }
  0x14   :  { %467 = shalt.err (!%p464_p9)
}
  0x15   :  { %s496_s17 = smov 128   ;;  %s497_s18 = smov 8  }
  0x16   :  { %31 = dma.hbm_to_vmem [thread:$0]  %s531_s1, 1152, %s26_s12, [#allocation6], %s496_s17, %s496_s17, %s497_s18  }
  0x17   :  { %488 = dma.done.wait [#allocation3], 256  }
  0x18   :  { %489 = vsyncadd [#allocation3], 4294967040 }
  0x19   :  { %490 = dma.done.wait [#allocation6], 1152  }
  0x1a   :  { %491 = vsyncadd [#allocation6], 4294966144  ;;  %v498_v0 = vmov 0.0   ;;  %v39_v1 = vld [vmem:[#allocation2 + $0x8] sm:$0xff]  ;;  %v38_v2 = vld [vmem:[#allocation2] sm:$0xff]  ;;  %vm44_vm0 = vcmask 64512   ;;  %v361_v44 = vlaneseq }
  0x1b   :  { %121 = vmatprep.mubr.f32.mxu0 %v498_v0  ;;  %235 = vmatprep.mubr.f32.mxu1 %v498_v0  ;;  %v40_v3 = vld [vmem:[#allocation5] sm:$0xff]  ;;  %v41_v4 = vld [vmem:[#allocation5 + $0x8] sm:$0xff]  ;;  %v42_v5 = vld [vmem:[#allocation5 + $0x10] sm:$0xff]  ;;  %vm158_vm1 = vcmask 261120   ;;  %v499_v56 = vmov 1983009808  }
  0x1c   :  { %87 = vmatprep.subr.mxu0 %v39_v1  ;;  %v43_v6 = vld [vmem:[#allocation5 + $0x18] sm:$0xff]  ;;  %v154_v23 = vld [vmem:[#allocation5 + $0x20] sm:$0xff]  ;;  %v155_v24 = vld [vmem:[#allocation5 + $0x28] sm:$0xff]  ;;  %v362_v49 = vshrl.u32 %v361_v44, 7  ;;  %v375_v57 = vunpack.c.l.s4 %v499_v56  ;;  %vm382_vm2 = vcmask 1040384   ;;  %vm383_vm3 = vcmask 1042434  }
  0x1d   :  { %88 = vmatpush1.msra.mxu0 %v38_v2  ;;  %v156_v25 = vld [vmem:[#allocation5 + $0x30] sm:$0xff]  ;;  %v157_v26 = vld [vmem:[#allocation5 + $0x38] sm:$0xff]  ;;  %v268_v43 = vld [vmem:[#allocation5 + $0x40] sm:$0xff]  ;;  %vm385_vm5 = vcmask 1044484   ;;  %vm387_vm7 = vcmask 1046534   ;;  %s500_s0 = smov [#allocation7]  }
  0x1e   :  { %411 = vmatmul.mubr.msk.f32.vlgmr.msra.gmra.mxu0 %vm44_vm0, %v40_v3  ;;  %v363_v54 = vsub.s32 0, %v362_v49  ;;  %v376_v62 = vunpack.c.0.s8 %v375_v57  ;;  %vm384_vm4 = vmor %vm382_vm2, %vm383_vm3  ;;  %s401_s1 = sshll.u32 %s500_s0, 4  ;;  %s402_s1 = int_to_ptr.vmem [resolvable:$true] %s401_s1 }
  0x1f   :  { %127 = vmatprep.mubr.f32.mxu0 %v498_v0  ;;  %vm386_vm6 = vmor %vm384_vm4, %vm385_vm5  ;;  %s468_s21 = scalar_lea.vmem %s402_s1, 64  ;;  %p473_p11 = scmp.lt.s32.totalorder %s402_s1, %s402_s1 }
  0x20   :  { %v379_v2 = vsub.s32 %v376_v62, %v362_v49  ;;  %vm388_vm8 = vmor %vm386_vm6, %vm387_vm7  ;;  %p469_p10 = scmp.ne.s32.totalorder %s402_s1, %s468_s21  ;;  %p474_p12 = scmp.lt.s32.totalorder %s468_s21, %s468_s21 }
  0x22   :  { %412 = vmatmul.mubr.msk.f32.gmra.mxu0 %vm44_vm0, %v41_v4  ;;  %p475_p13 = por %p474_p12, %p473_p11 }
  0x23   :  { %133 = vmatprep.mubr.f32.mxu0 %v498_v0 }
  0x24   :  { %p476_p0 = pnand %p475_p13, %p469_p10 }
  0x26   :  { %413 = vmatmul.mubr.msk.f32.gmra.mxu0 %vm44_vm0, %v42_v5 }
  0x27   :  { %139 = vmatprep.mubr.f32.mxu0 %v498_v0 }
  0x2a   :  { %414 = vmatmul.mubr.msk.f32.gmra.mxu0 %vm44_vm0, %v43_v6 }
  0x2b   :  { %336 = vmatprep.mubr.f32.mxu0 %v498_v0 }
  0xde   :  { %v123_v7 = vpop.f32.mrf.mxu0 }
  0xdf   :  { %v146_v22 = vmax.f32 %v123_v7, 0.0 }
  0xe0   :  { %v125_v8 = vpop.f32.mrf.mxu0 }
  0xe1   :  { %v147_v21 = vmax.f32 %v125_v8, 0.0 }
  0xe2   :  { %v129_v9 = vpop.f32.mrf.mxu0 }
  0xe3   :  { %v148_v20 = vmax.f32 %v129_v9, 0.0 }
  0xe4   :  { %v131_v10 = vpop.f32.mrf.mxu0 }
  0xe5   :  { %v149_v19 = vmax.f32 %v131_v10, 0.0 }
  0xe6   :  { %v135_v11 = vpop.f32.mrf.mxu0 }
  0xe7   :  { %v150_v18 = vmax.f32 %v135_v11, 0.0 }
  0xe8   :  { %v137_v12 = vpop.f32.mrf.mxu0 }
  0xe9   :  { %v151_v17 = vmax.f32 %v137_v12, 0.0 }
  0xea   :  { %v141_v13 = vpop.f32.mrf.mxu0 }
  0xeb   :  { %v152_v16 = vmax.f32 %v141_v13, 0.0 }
  0xec   :  { %v143_v14 = vpop.f32.mrf.mxu0 }
  0xed   :  { %v153_v15 = vmax.f32 %v143_v14, 0.0 }
  0xef   :  { %195 = vmatprep.subr.mxu1 %v153_v15 }
  0xf0   :  { %196 = vmatpush1.msra.mxu1 %v152_v16 }
  0xf1   :  { %197 = vmatprep.subr.mxu1 %v151_v17 }
  0xf2   :  { %198 = vmatpush1.msra.mxu1 %v150_v18 }
  0xf3   :  { %199 = vmatprep.subr.mxu1 %v149_v19 }
  0xf4   :  { %200 = vmatpush1.msra.mxu1 %v148_v20 }
  0xf5   :  { %201 = vmatprep.subr.mxu1 %v147_v21 }
  0xf6   :  { %202 = vmatpush1.msra.mxu1 %v146_v22 }
  0xf7   :  { %415 = vmatmul.mubr.msk.f32.vlgmr.msra.gmra.mxu1 %vm158_vm1, %v154_v23 }
  0xf8   :  { %241 = vmatprep.mubr.f32.mxu1 %v498_v0 }
  0xfb   :  { %416 = vmatmul.mubr.msk.f32.gmra.mxu1 %vm158_vm1, %v155_v24 }
  0xfc   :  { %247 = vmatprep.mubr.f32.mxu1 %v498_v0 }
  0xff   :  { %417 = vmatmul.mubr.msk.f32.gmra.mxu1 %vm158_vm1, %v156_v25 }
 0x100   :  { %253 = vmatprep.mubr.f32.mxu1 %v498_v0 }
 0x103   :  { %418 = vmatmul.mubr.msk.f32.gmra.mxu1 %vm158_vm1, %v157_v26 }
 0x1b7   :  { %v237_v27 = vpop.f32.mrf.mxu1 }
 0x1b8   :  { %v260_v42 = vmax.f32 %v237_v27, 0.0 }
 0x1b9   :  { %v239_v28 = vpop.f32.mrf.mxu1 }
 0x1ba   :  { %v261_v41 = vmax.f32 %v239_v28, 0.0 }
 0x1bb   :  { %v243_v29 = vpop.f32.mrf.mxu1 }
 0x1bc   :  { %v262_v40 = vmax.f32 %v243_v29, 0.0 }
 0x1bd   :  { %v245_v30 = vpop.f32.mrf.mxu1 }
 0x1be   :  { %v263_v39 = vmax.f32 %v245_v30, 0.0 }
 0x1bf   :  { %v249_v31 = vpop.f32.mrf.mxu1 }
 0x1c0   :  { %v264_v38 = vmax.f32 %v249_v31, 0.0 }
 0x1c1   :  { %v251_v32 = vpop.f32.mrf.mxu1 }
 0x1c2   :  { %v265_v37 = vmax.f32 %v251_v32, 0.0 }
 0x1c3   :  { %v255_v33 = vpop.f32.mrf.mxu1 }
 0x1c4   :  { %v266_v36 = vmax.f32 %v255_v33, 0.0 }
 0x1c5   :  { %v257_v34 = vpop.f32.mrf.mxu1 }
 0x1c6   :  { %v267_v35 = vmax.f32 %v257_v34, 0.0 }
 0x1c8   :  { %296 = vmatprep.subr.mxu0 %v267_v35 }
 0x1c9   :  { %297 = vmatpush1.msra.mxu0 %v266_v36 }
 0x1ca   :  { %298 = vmatprep.subr.mxu0 %v265_v37 }
 0x1cb   :  { %299 = vmatpush1.msra.mxu0 %v264_v38 }
 0x1cc   :  { %300 = vmatprep.subr.mxu0 %v263_v39 }
 0x1cd   :  { %301 = vmatpush1.msra.mxu0 %v262_v40 }
 0x1ce   :  { %302 = vmatprep.subr.mxu0 %v261_v41 }
 0x1cf   :  { %303 = vmatpush1.msra.mxu0 %v260_v42 }
 0x1d0   :  { %419 = vmatmul.mubr.msk.f32.vlgmr.msra.gmra.mxu0 %vm158_vm1, %v268_v43 }
 0x290   :  { %v338_v45 = vpop.f32.mrf.mxu0 }
 0x291   :  { %v345_v46 = vrot.slane %v338_v45, 1 }
 0x292   :  { %v340_v47 = vpop.f32.mrf.mxu0 }
 0x293   :  { %v349_v48 = vadd.f32 %v345_v46, %v338_v45  ;;  %v346_v50 = vrot.slane %v340_v47, 1 }
 0x295   :  { %v351_v51 = vmul.f32 0.5, %v349_v48  ;;  %v350_v52 = vadd.f32 %v346_v50, %v340_v47 }
 0x297   :  { %v355_v53 = vrot.slane %v351_v51, 1  ;;  %v352_v55 = vmul.f32 0.5, %v350_v52 }
 0x299   :  { %v359_v58 = vsub.f32 %v338_v45, %v355_v53  ;;  %v356_v59 = vrot.slane %v352_v55, 1 }
 0x29b   :  { %v364_v60 = vrot.slane %v359_v58, %v363_v54  ;;  %v360_v61 = vsub.f32 %v340_v47, %v356_v59 }
 0x29d   :  { %v368_v63 = vrot.slane %v360_v61, %v363_v54  ;;  %v369_v0 = vadd.f32 %v364_v60, %v338_v45 }
 0x29f   :  { %v370_v1 = vadd.f32 %v368_v63, %v340_v47 }
 0x2a1   :  { %v373_v3 = vcombine.low %v369_v0, %v370_v1 }
 0x2a3   :  { %v380_v4 = vrot.slane %v373_v3, %v379_v2 }
 0x2a5   :  { %v381_v5 = vcombine.high %v380_v4, %v380_v4  ;;  %v420_v6 = vrot.slane %v380_v4, 9 }
 0x2a7   :  { %v391_v7 = vrot.slane %v381_v5, 7 }
 0x2a9   :  { %v392_v8 = vsel %vm388_vm8, %v420_v6, %v391_v7 }
 0x2aa   :  { %394 = vst [vmem:[#allocation7] sm:$0xf] %v392_v8 }
 0x2ab   :  { %479 = shalt.err (!%p476_p0)
}
 0x2ac   :  { %404 = dma.vmem_to_hbm [thread:$0]  %s402_s1, 64, %s532_s2, [#allocation4]  }
 0x2ad   :  { %492 = dma.done.wait [#allocation4], 64  }
 0x2ae   :  { %493 = vsyncadd [#allocation4], 4294967232 }
 0x2af   :  { %408 = vsyncpa [#allocation3], 1 }
 0x2b0   :  { %409 = vsyncpa [#allocation6], 1 }
 0x2b1   :  { %410 = vsyncpa [#allocation4], 1 }

</bundles_post_ra>
